<compile_context>
chip_gen: v7x
topology: tpu7x:2x2x1
jax: 0.10.0
libtpu: 0.0.40
codegen_flags: <defaults>
</compile_context>

<pallas_src>
import functools

import jax
import jax.numpy as jnp
from jax.experimental import pallas as pl
from jax.experimental.pallas import tpu as pltpu

HIDDEN = 128
LANE = 128
TB_MAX = 1024  # max batch rows per grid step (sweepable 512-2048)


def _round_up(x, m):
    return (x + m - 1) // m * m


def mlp_kernel(x_ref, w1_ref, b1_ref, w2_ref, b2_ref, w3_ref, b3_ref, o_ref):
    prec = jax.lax.Precision.HIGHEST
    x = x_ref[...]
    # Layer 1: Linear(input_shape -> 128) + ReLU  (contraction dim unpadded)
    h1 = jnp.dot(x, w1_ref[...], preferred_element_type=jnp.float32,
                 precision=prec) + b1_ref[...]
    h1 = jnp.maximum(h1, 0.0)
    # Layer 2: Linear(128 -> 128) + ReLU
    h2 = jnp.dot(h1, w2_ref[...], preferred_element_type=jnp.float32,
                 precision=prec) + b2_ref[...]
    h2 = jnp.maximum(h2, 0.0)
    # Layer 3: Linear(128 -> N_pad), no activation; lane-dense (128-wide) store.
    out = jnp.dot(h2, w3_ref[...], preferred_element_type=jnp.float32,
                  precision=prec) + b3_ref[...]
    o_ref[...] = out.astype(o_ref.dtype)


def _choose_tiling(batch):
    """Pick (TB, B_pad, n_steps).

    - n_steps >= ceil(B / TB_MAX) keeps tiles <= TB_MAX rows.
    - n_steps >= 2 whenever B >= 16 so the "parallel" batch axis can shard
      across both TensorCores on v7x.
    - TB is the smallest multiple of 8 covering ceil(B / n_steps), which caps
      padded-row waste at < 8 * n_steps rows.
    """
    n_steps = max(pl.cdiv(batch, TB_MAX), 2 if batch >= 16 else 1)
    tb = _round_up(max(pl.cdiv(batch, n_steps), 1), 8)
    b_pad = tb * n_steps
    return tb, b_pad, n_steps


@functools.partial(jax.jit, static_argnames=("num_actions",))
def neural_network_forward(x, padded_params, *, num_actions):
    """x: [B, input_shape] float32.  padded_params: dict from pad_params().

    Returns [B, num_actions] float32, matching the PyTorch forward.
    """
    w1 = padded_params["w1"]   # [input_shape, 128]  (unpadded contraction dim)
    b1 = padded_params["b1"]   # [1, 128]
    w2 = padded_params["w2"]   # [128, 128]
    b2 = padded_params["b2"]   # [1, 128]
    w3 = padded_params["w3"]   # [128, N_pad]        (N zero-padded to 128)
    b3 = padded_params["b3"]   # [1, N_pad]

    x = x.astype(jnp.float32)
    B, K = x.shape
    N_pad = w3.shape[1]

    TB, B_pad, n_steps = _choose_tiling(B)

    # Pad rows only (to a multiple of 8 * n_steps); padded rows are inert and
    # sliced off below.  No column padding and no extra HBM pass for x.
    x_in = x if B_pad == B else jnp.pad(x, ((0, B_pad - B), (0, 0)))

    resident = lambda i: (0, 0)   # weights/biases stay in VMEM across steps

    out = pl.pallas_call(
        mlp_kernel,
        out_shape=jax.ShapeDtypeStruct((B_pad, N_pad), jnp.float32),
        grid=(n_steps,),
        in_specs=[
            pl.BlockSpec((TB, K), lambda i: (i, 0)),      # x: batch-tiled, K unpadded
            pl.BlockSpec((K, HIDDEN), resident),          # w1
            pl.BlockSpec((1, HIDDEN), resident),          # b1
            pl.BlockSpec((HIDDEN, HIDDEN), resident),     # w2
            pl.BlockSpec((1, HIDDEN), resident),          # b2
            pl.BlockSpec((HIDDEN, N_pad), resident),      # w3
            pl.BlockSpec((1, N_pad), resident),           # b3
        ],
        out_specs=pl.BlockSpec((TB, N_pad), lambda i: (i, 0)),
        compiler_params=pltpu.CompilerParams(
            dimension_semantics=("parallel",),
        ),
    )(x_in, w1, b1, w2, b2, w3, b3)

    # Slice back to the logical shape.
    return out[:B, :num_actions]


def init_params(key, input_shape, num_actions, hidden=HIDDEN):
    """Deterministic init mimicking PyTorch Linear default (uniform +-1/sqrt(fan_in)).
    Weights stored as [in, out] (already transposed vs. PyTorch's [out, in])."""
    ks = jax.random.split(key, 6)

    def lin(kw, kb, fan_in, fan_out):
        bound = 1.0 / jnp.sqrt(jnp.float32(fan_in))
        w = jax.random.uniform(kw, (fan_in, fan_out), jnp.float32, -bound, bound)
        b = jax.random.uniform(kb, (1, fan_out), jnp.float32, -bound, bound)
        return w, b

    w1, b1 = lin(ks[0], ks[1], input_shape, hidden)
    w2, b2 = lin(ks[2], ks[3], hidden, hidden)
    w3, b3 = lin(ks[4], ks[5], hidden, num_actions)
    return {"w1": w1, "b1": b1, "w2": w2, "b2": b2, "w3": w3, "b3": b3}


def pad_params(params, num_actions, hidden=HIDDEN):
    """One-time zero padding of the OUTPUT dim only: layer-3 N -> 128 lanes.
    w1 is kept unpadded (contraction dim == input_shape)."""
    N_pad = _round_up(max(num_actions, 1), LANE)
    w3 = jnp.zeros((hidden, N_pad), jnp.float32).at[:, :num_actions].set(params["w3"])
    b3 = jnp.zeros((1, N_pad), jnp.float32).at[:, :num_actions].set(params["b3"])
    return {"w1": params["w1"], "b1": params["b1"],
            "w2": params["w2"], "b2": params["b2"],
            "w3": w3, "b3": b3}


def _reference(x, params):
    h = jnp.maximum(x @ params["w1"] + params["b1"], 0.0)
    h = jnp.maximum(h @ params["w2"] + params["b2"], 0.0)
    return h @ params["w3"] + params["b3"]


if __name__ == "__main__":
    key = jax.random.PRNGKey(0)
    k_x, k_p, k_xb = jax.random.split(key, 3)

    batch = 8
    input_shape = 32
    num_actions = 8

    x = jax.random.normal(k_x, (batch, input_shape), dtype=jnp.float32)
    params = init_params(k_p, input_shape, num_actions)
    padded = pad_params(params, num_actions)

    # Small batch: single grid step, no row padding.
    out = neural_network_forward(x, padded, num_actions=num_actions)
    jax.block_until_ready(out)
    ref = _reference(x, params)
    assert out.shape == (batch, num_actions)
    assert jnp.allclose(out, ref, atol=1e-5, rtol=1e-5)

    # Larger batch: exercises the multi-step (parallel) grid path with
    # adaptive TB (B=300 -> TB=152, grid=(2,), only 4 padded rows).
    xb = jax.random.normal(k_xb, (300, input_shape), dtype=jnp.float32)
    outb = neural_network_forward(xb, padded, num_actions=num_actions)
    jax.block_until_ready(outb)
    refb = _reference(xb, params)
    assert outb.shape == (300, num_actions)
    assert jnp.allclose(outb, refb, atol=1e-5, rtol=1e-5)

    print("KERNEL_OK")
</pallas_src>

<mosaic_0001>
module attributes {stable_mosaic.version = 11 : i64} {
  func.func @mlp_kernel(%arg0: i32, %arg1: memref<8x32xf32, #tpu.memory_space<vmem>>, %arg2: memref<32x128xf32, #tpu.memory_space<vmem>>, %arg3: memref<1x128xf32, #tpu.memory_space<vmem>>, %arg4: memref<128x128xf32, #tpu.memory_space<vmem>>, %arg5: memref<1x128xf32, #tpu.memory_space<vmem>>, %arg6: memref<128x128xf32, #tpu.memory_space<vmem>>, %arg7: memref<1x128xf32, #tpu.memory_space<vmem>>, %arg8: memref<8x128xf32, #tpu.memory_space<vmem>>) attributes {dimension_semantics = [#tpu.dimension_semantics<parallel>], iteration_bounds = array<i64: 1>, scalar_prefetch = 0 : i64, scratch_operands = 0 : i64, tpu.core_type = #tpu.core_type<tc>, window_params = [{transform_indices = @transform_0, window_bounds = array<i64: 8, 32>}, {pipeline_mode = #tpu.pipeline_mode<synchronous>, transform_indices = @transform_1, window_bounds = array<i64: 32, 128>}, {pipeline_mode = #tpu.pipeline_mode<synchronous>, transform_indices = @transform_2, window_bounds = array<i64: 1, 128>}, {pipeline_mode = #tpu.pipeline_mode<synchronous>, transform_indices = @transform_3, window_bounds = array<i64: 128, 128>}, {pipeline_mode = #tpu.pipeline_mode<synchronous>, transform_indices = @transform_4, window_bounds = array<i64: 1, 128>}, {pipeline_mode = #tpu.pipeline_mode<synchronous>, transform_indices = @transform_5, window_bounds = array<i64: 128, 128>}, {pipeline_mode = #tpu.pipeline_mode<synchronous>, transform_indices = @transform_6, window_bounds = array<i64: 1, 128>}, {transform_indices = @transform_7, window_bounds = array<i64: 8, 128>}]} {
    %c0 = arith.constant 0 : index
    %c0_0 = arith.constant 0 : index
    %0 = vector.load %arg1[%c0, %c0_0] : memref<8x32xf32, #tpu.memory_space<vmem>>, vector<8x32xf32>
    %c0_1 = arith.constant 0 : index
    %c0_2 = arith.constant 0 : index
    %1 = vector.load %arg2[%c0_1, %c0_2] : memref<32x128xf32, #tpu.memory_space<vmem>>, vector<32x128xf32>
    %cst = arith.constant dense<0.000000e+00> : vector<8x128xf32>
    %2 = tpu.matmul %0, %1, %cst {dimension_numbers = #tpu.dot_dimension_numbers<[1], [0], [0], [1], [0, 0, 1, 1], [], []>, precision = #tpu.contract_precision<fp32>} : vector<8x32xf32>, vector<32x128xf32>, vector<8x128xf32> -> vector<8x128xf32>
    %c0_3 = arith.constant 0 : index
    %c0_4 = arith.constant 0 : index
    %3 = vector.load %arg3[%c0_3, %c0_4] : memref<1x128xf32, #tpu.memory_space<vmem>>, vector<1x128xf32>
    %4 = vector.broadcast %3 : vector<1x128xf32> to vector<8x128xf32>
    %5 = arith.addf %2, %4 : vector<8x128xf32>
    %cst_5 = arith.constant 0.000000e+00 : f32
    %6 = vector.broadcast %cst_5 : f32 to vector<8x128xf32>
    %7 = arith.maximumf %5, %6 : vector<8x128xf32>
    %c0_6 = arith.constant 0 : index
    %c0_7 = arith.constant 0 : index
    %8 = vector.load %arg4[%c0_6, %c0_7] : memref<128x128xf32, #tpu.memory_space<vmem>>, vector<128x128xf32>
    %cst_8 = arith.constant dense<0.000000e+00> : vector<8x128xf32>
    %9 = tpu.matmul %7, %8, %cst_8 {dimension_numbers = #tpu.dot_dimension_numbers<[1], [0], [0], [1], [0, 0, 1, 1], [], []>, precision = #tpu.contract_precision<fp32>} : vector<8x128xf32>, vector<128x128xf32>, vector<8x128xf32> -> vector<8x128xf32>
    %c0_9 = arith.constant 0 : index
    %c0_10 = arith.constant 0 : index
    %10 = vector.load %arg5[%c0_9, %c0_10] : memref<1x128xf32, #tpu.memory_space<vmem>>, vector<1x128xf32>
    %11 = vector.broadcast %10 : vector<1x128xf32> to vector<8x128xf32>
    %12 = arith.addf %9, %11 : vector<8x128xf32>
    %cst_11 = arith.constant 0.000000e+00 : f32
    %13 = vector.broadcast %cst_11 : f32 to vector<8x128xf32>
    %14 = arith.maximumf %12, %13 : vector<8x128xf32>
    %c0_12 = arith.constant 0 : index
    %c0_13 = arith.constant 0 : index
    %15 = vector.load %arg6[%c0_12, %c0_13] : memref<128x128xf32, #tpu.memory_space<vmem>>, vector<128x128xf32>
    %cst_14 = arith.constant dense<0.000000e+00> : vector<8x128xf32>
    %16 = tpu.matmul %14, %15, %cst_14 {dimension_numbers = #tpu.dot_dimension_numbers<[1], [0], [0], [1], [0, 0, 1, 1], [], []>, precision = #tpu.contract_precision<fp32>} : vector<8x128xf32>, vector<128x128xf32>, vector<8x128xf32> -> vector<8x128xf32>
    %c0_15 = arith.constant 0 : index
    %c0_16 = arith.constant 0 : index
    %17 = vector.load %arg7[%c0_15, %c0_16] : memref<1x128xf32, #tpu.memory_space<vmem>>, vector<1x128xf32>
    %18 = vector.broadcast %17 : vector<1x128xf32> to vector<8x128xf32>
    %19 = arith.addf %16, %18 : vector<8x128xf32>
    %c0_17 = arith.constant 0 : index
    %c0_18 = arith.constant 0 : index
    %20 = vector.load %arg8[%c0_17, %c0_18] : memref<8x128xf32, #tpu.memory_space<vmem>>, vector<8x128xf32>
    tpu.vector_store %arg8[%c0_17, %c0_18], %19 {strides = array<i32>} : memref<8x128xf32, #tpu.memory_space<vmem>>, vector<8x128xf32>,
    return
  }
  func.func @transform_0(%arg0: i32) -> (i32, i32) {
    %c0_i32 = arith.constant 0 : i32
    %c0_i32_0 = arith.constant 0 : i32
    return %arg0, %c0_i32 : i32, i32
  }
  func.func @transform_1(%arg0: i32) -> (i32, i32) {
    %c0_i32 = arith.constant 0 : i32
    %c0_i32_0 = arith.constant 0 : i32
    %c0_i32_1 = arith.constant 0 : i32
    return %c0_i32, %c0_i32_0 : i32, i32
  }
  func.func @transform_2(%arg0: i32) -> (i32, i32) {
    %c0_i32 = arith.constant 0 : i32
    %c0_i32_0 = arith.constant 0 : i32
    %c0_i32_1 = arith.constant 0 : i32
    return %c0_i32, %c0_i32_0 : i32, i32
  }
  func.func @transform_3(%arg0: i32) -> (i32, i32) {
    %c0_i32 = arith.constant 0 : i32
    %c0_i32_0 = arith.constant 0 : i32
    %c0_i32_1 = arith.constant 0 : i32
    return %c0_i32, %c0_i32_0 : i32, i32
  }
  func.func @transform_4(%arg0: i32) -> (i32, i32) {
    %c0_i32 = arith.constant 0 : i32
    %c0_i32_0 = arith.constant 0 : i32
    %c0_i32_1 = arith.constant 0 : i32
    return %c0_i32, %c0_i32_0 : i32, i32
  }
  func.func @transform_5(%arg0: i32) -> (i32, i32) {
    %c0_i32 = arith.constant 0 : i32
    %c0_i32_0 = arith.constant 0 : i32
    %c0_i32_1 = arith.constant 0 : i32
    return %c0_i32, %c0_i32_0 : i32, i32
  }
  func.func @transform_6(%arg0: i32) -> (i32, i32) {
    %c0_i32 = arith.constant 0 : i32
    %c0_i32_0 = arith.constant 0 : i32
    %c0_i32_1 = arith.constant 0 : i32
    return %c0_i32, %c0_i32_0 : i32, i32
  }
  func.func @transform_7(%arg0: i32) -> (i32, i32) {
    %c0_i32 = arith.constant 0 : i32
    %c0_i32_0 = arith.constant 0 : i32
    return %arg0, %c0_i32 : i32, i32
  }
}

</mosaic_0001>

<bundles_post_ra>
// kernel: neural_network_forward.1
= control target key start
LH: loop header
LB: loop body
LE: loop exit
PB: predicated region body
PF: predicated region fallthrough
CT: control target
= control target key end

     0   :  { %12 = vsyncpa [#allocation3], 0  ;;  %s3927_s0 = inlined_call_operand.hbm [shape: f32[8,32], index: 0, kind: input, shape index: {}]   ;;  %s3928_s1 = inlined_call_operand.hbm [shape: f32[32,128], index: 1, kind: input, shape index: {}]   ;;  %s3929_s2 = inlined_call_operand.vmem [shape: f32[1,128], index: 2, kind: input, shape index: {}]   ;;  %s3930_s3 = inlined_call_operand.hbm [shape: f32[128,128], index: 3, kind: input, shape index: {}]   ;;  %s3931_s4 = inlined_call_operand.vmem [shape: f32[1,128], index: 4, kind: input, shape index: {}]   ;;  %s3932_s5 = inlined_call_operand.hbm [shape: f32[128,128], index: 5, kind: input, shape index: {}]   ;;  %s3933_s6 = inlined_call_operand.vmem [shape: f32[1,128], index: 6, kind: input, shape index: {}]   ;;  %s3934_s7 = inlined_call_operand.hbm [shape: f32[8,128], index: 7, kind: output, shape index: {}]  }
   0x1   :  { %13 = vsyncpa [#allocation6], 0 }
   0x2   :  { %14 = vsyncpa [#allocation9], 0 }
   0x3   :  { %15 = vsyncpa [#allocation4], 0  ;;  %s3136_s24 = smov [#allocation5]   ;;  %s3018_s28 = scalar_lea.hbm %s3928_s1, 512 }
   0x4   :  { %s31_s25 = sshll.u32 %s3136_s24, 4  ;;  %p3019_p0 = scmp.ne.s32.totalorder %s3928_s1, %s3018_s28  ;;  %s32_s25 = int_to_ptr.vmem [resolvable:$true] %s31_s25 }
   0x5   :  { %p3022_p1 = scmp.lt.u32.totalorder %s3018_s28, %s3928_s1 }
   0x7   :  { %p3024_p2 = pnand %p3022_p1, %p3019_p0 }
   0x9   :  { %3027 = shalt.err (!%p3024_p2)
}
   0xa   :  { %s3028_s10 = scalar_lea.vmem %s32_s25, 512  ;;  %p3033_p4 = scmp.lt.s32.totalorder %s32_s25, %s32_s25 }
   0xb   :  { %p3029_p3 = scmp.ne.s32.totalorder %s32_s25, %s3028_s10  ;;  %p3034_p5 = scmp.lt.s32.totalorder %s3028_s10, %s3028_s10 }
   0xd   :  { %p3035_p6 = por %p3034_p5, %p3033_p4 }
   0xf   :  { %p3036_p7 = pnand %p3035_p6, %p3029_p3 }
  0x11   :  { %3039 = shalt.err (!%p3036_p7)
}
  0x12   :  { %s3137_s11 = smov 128   ;;  %s3138_s12 = smov 8  }
  0x13   :  { %37 = dma.hbm_to_vmem [thread:$0]  %s3928_s1, 512, %s32_s25, [#allocation6], %s3137_s11, %s3137_s11, %s3138_s12  }
  0x14   :  { %s3139_s15 = smov [#allocation2]   ;;  %s3140_s17 = smov [#allocation7]  }
  0x15   :  { %s22_s16 = sshll.u32 %s3139_s15, 4  ;;  %s45_s18 = sshll.u32 %s3140_s17, 4  ;;  %s23_s16 = int_to_ptr.vmem [resolvable:$true] %s22_s16  ;;  %s46_s18 = int_to_ptr.vmem [resolvable:$true] %s45_s18 }
  0x16   :  { %s3040_s21 = scalar_lea.hbm %s3927_s0, 128 }
  0x17   :  { %p3041_p8 = scmp.ne.s32.totalorder %s3927_s0, %s3040_s21  ;;  %p3044_p9 = scmp.lt.u32.totalorder %s3040_s21, %s3927_s0 }
  0x19   :  { %p3046_p10 = pnand %p3044_p9, %p3041_p8 }
  0x1b   :  { %3049 = shalt.err (!%p3046_p10)
}
  0x1c   :  { %s3050_s1 = scalar_lea.vmem %s23_s16, 128  ;;  %p3055_p12 = scmp.lt.s32.totalorder %s23_s16, %s23_s16 }
  0x1d   :  { %p3051_p11 = scmp.ne.s32.totalorder %s23_s16, %s3050_s1  ;;  %p3056_p13 = scmp.lt.s32.totalorder %s3050_s1, %s3050_s1 }
  0x1f   :  { %p3057_p0 = por %p3056_p13, %p3055_p12 }
  0x21   :  { %p3058_p1 = pnand %p3057_p0, %p3051_p11 }
  0x23   :  { %3061 = shalt.err (!%p3058_p1)
}
  0x24   :  { %25 = dma.hbm_to_vmem [thread:$0]  %s3927_s0, 128, %s23_s16, [#allocation3]  }
  0x25   :  { %s3062_s30 = scalar_lea.hbm %s3930_s3, 2048 }
  0x26   :  { %p3063_p2 = scmp.ne.s32.totalorder %s3930_s3, %s3062_s30  ;;  %p3066_p3 = scmp.lt.u32.totalorder %s3062_s30, %s3930_s3 }
  0x28   :  { %p3068_p4 = pnand %p3066_p3, %p3063_p2 }
  0x2a   :  { %3071 = shalt.err (!%p3068_p4)
}
  0x2b   :  { %s3072_s14 = scalar_lea.vmem %s46_s18, 2048  ;;  %p3077_p6 = scmp.lt.s32.totalorder %s46_s18, %s46_s18 }
  0x2c   :  { %p3073_p5 = scmp.ne.s32.totalorder %s46_s18, %s3072_s14  ;;  %p3078_p7 = scmp.lt.s32.totalorder %s3072_s14, %s3072_s14 }
  0x2e   :  { %p3079_p8 = por %p3078_p7, %p3077_p6 }
  0x30   :  { %p3080_p9 = pnand %p3079_p8, %p3073_p5 }
  0x32   :  { %3083 = shalt.err (!%p3080_p9)
}
  0x33   :  { %51 = dma.hbm_to_vmem [thread:$0]  %s3930_s3, 2048, %s46_s18, [#allocation6], %s3137_s11, %s3137_s11, %s3138_s12  }
  0x34   :  { %s3141_s16 = smov [#allocation8]   ;;  %s3084_s21 = scalar_lea.hbm %s3932_s5, 2048 }
  0x35   :  { %s59_s17 = sshll.u32 %s3141_s16, 4  ;;  %p3085_p10 = scmp.ne.s32.totalorder %s3932_s5, %s3084_s21  ;;  %s60_s17 = int_to_ptr.vmem [resolvable:$true] %s59_s17 }
  0x36   :  { %p3088_p11 = scmp.lt.u32.totalorder %s3084_s21, %s3932_s5 }
  0x38   :  { %p3090_p12 = pnand %p3088_p11, %p3085_p10 }
  0x3a   :  { %3093 = shalt.err (!%p3090_p12)
}
  0x3b   :  { %s3094_s1 = scalar_lea.vmem %s60_s17, 2048  ;;  %p3099_p0 = scmp.lt.s32.totalorder %s60_s17, %s60_s17 }
  0x3c   :  { %p3095_p13 = scmp.ne.s32.totalorder %s60_s17, %s3094_s1  ;;  %p3100_p1 = scmp.lt.s32.totalorder %s3094_s1, %s3094_s1 }
  0x3e   :  { %p3101_p2 = por %p3100_p1, %p3099_p0 }
  0x40   :  { %p3102_p3 = pnand %p3101_p2, %p3095_p13 }
  0x42   :  { %3105 = shalt.err (!%p3102_p3)
}
  0x43   :  { %65 = dma.hbm_to_vmem [thread:$0]  %s3932_s5, 2048, %s60_s17, [#allocation9], %s3137_s11, %s3137_s11, %s3138_s12  }
  0x44   :  { %3128 = dma.done.wait [#allocation3], 128  }
  0x45   :  { %3129 = vsyncadd [#allocation3], 4294967168 }
  0x46   :  { %3130 = dma.done.wait [#allocation6], 2560  }
  0x47   :  { %3131 = vsyncadd [#allocation6], 4294964736 }
  0x48   :  { %3132 = dma.done.wait [#allocation9], 2048  }
  0x49   :  { %3133 = vsyncadd [#allocation9], 4294965248  ;;  %v3142_v0 = vmov 0.0|0.0   ;;  %vm3143_vm0 = vmmov 0   ;;  %v3957_v1 = vmov 0.0   ;;  %vm92_vm1 = vcmask 261120  }
  0x4a   :  { %2652 = vmatprep.subr.bf16.mxu0 %v3142_v0  ;;  %2174 = vmatprep.mubr.msk.f32.mxu0 %vm3143_vm0, %v3957_v1  ;;  %v81_v2 = vld [vmem:[#allocation5] sm:$0xff]  ;;  %v82_v3 = vld [vmem:[#allocation5 + $0x8] sm:$0xff]  ;;  %v83_v4 = vld [vmem:[#allocation5 + $0x10] sm:$0xff]  ;;  %s3145_s27 = smov [#allocation10]  }
  0x4b   :  { %2688 = vmatprep.subr.bf16.mxu1 %v3142_v0  ;;  %2264 = vmatprep.mubr.msk.f32.mxu1 %vm3143_vm0, %v3957_v1  ;;  %v97_v5 = vand.u32 4294901760, %v81_v2  ;;  %v100_v6 = vand.u32 4294901760, %v82_v3  ;;  %v84_v7 = vld [vmem:[#allocation5 + $0x18] sm:$0xff]  ;;  %v103_v8 = vand.u32 4294901760, %v83_v4  ;;  %v582_v10 = vld [vmem:[#allocation7] sm:$0xff]  ;;  %v583_v13 = vld [vmem:[#allocation7 + $0x8] sm:$0xff] }
  0x4c   :  { %v80_v9 = vld [vmem:[#allocation2] sm:$0xff]  ;;  %v106_v11 = vand.u32 4294901760, %v84_v7  ;;  %v606_v14 = vand.u32 4294901760, %v582_v10  ;;  %v609_v21 = vand.u32 4294901760, %v583_v13  ;;  %v584_v32 = vld [vmem:[#allocation7 + $0x10] sm:$0xff]  ;;  %v586_v37 = vld [vmem:[#allocation7 + $0x20] sm:$0xff] }
  0x4d   :  { %v94_v12 = vsel %vm92_vm1, %v80_v9, 0  ;;  %v3249_v15 = vpack.c.bf16 %v100_v6, %v97_v5  ;;  %v3251_v16 = vsub.f32 %v81_v2, %v97_v5  ;;  %v3253_v17 = vsub.f32 %v82_v3, %v100_v6  ;;  %v585_v33 = vld [vmem:[#allocation7 + $0x18] sm:$0xff]  ;;  %v587_v38 = vld [vmem:[#allocation7 + $0x28] sm:$0xff]  ;;  %v588_v42 = vld [vmem:[#allocation7 + $0x30] sm:$0xff]  ;;  %s1918_s28 = sshll.u32 %s3145_s27, 4  ;;  %s1919_s28 = int_to_ptr.vmem [resolvable:$true] %s1918_s28 }
  0x4e   :  { %v3255_v18 = vsub.f32 %v83_v4, %v103_v8  ;;  %v3257_v19 = vsub.f32 %v84_v7, %v106_v11  ;;  %v3259_v20 = vand.u32 4294901760, %v94_v12  ;;  %v3262_v22 = vpack.c.bf16 %v106_v11, %v103_v8  ;;  %v589_v51 = vld [vmem:[#allocation7 + $0x38] sm:$0xff]  ;;  %v590_v56 = vld [vmem:[#allocation7 + $0x40] sm:$0xff]  ;;  %v591_v57 = vld [vmem:[#allocation7 + $0x48] sm:$0xff]  ;;  %s3106_s29 = scalar_lea.vmem %s1919_s28, 128  ;;  %p3111_p5 = scmp.lt.s32.totalorder %s1919_s28, %s1919_s28 }
  0x4f   :  { %2654 = vmatpush3.bf16.msra.mxu0 %v3249_v15  ;;  %v178_v23 = vand.u32 4294901760, %v3251_v16  ;;  %v185_v24 = vand.u32 4294901760, %v3253_v17  ;;  %v3272_v28 = vpack.c.bf16 %v609_v21, %v606_v14  ;;  %v3288_v36 = vsub.f32 %v582_v10, %v606_v14  ;;  %v592_v14 = vld [vmem:[#allocation7 + $0x50] sm:$0xff]  ;;  %p3107_p4 = scmp.ne.s32.totalorder %s1919_s28, %s3106_s29  ;;  %p3112_p6 = scmp.lt.s32.totalorder %s3106_s29, %s3106_s29 }
  0x50   :  { %v192_v25 = vand.u32 4294901760, %v3255_v18  ;;  %2655 = vmatprep.subr.bf16.mxu0 %v3142_v0  ;;  %v3269_v26 = vsub.f32 %v94_v12, %v3259_v20  ;;  %v199_v27 = vand.u32 4294901760, %v3257_v19  ;;  %v3291_v41 = vsub.f32 %v583_v13, %v609_v21  ;;  %v595_v21 = vld [vmem:[#allocation7 + $0x68] sm:$0xff] }
  0x51   :  { %v179_v29 = vsub.f32 %v3251_v16, %v178_v23  ;;  %v186_v30 = vsub.f32 %v3253_v17, %v185_v24  ;;  %2690 = vmatpush3.bf16.msra.mxu1 %v3272_v28  ;;  %v612_v45 = vand.u32 4294901760, %v584_v32  ;;  %v615_v46 = vand.u32 4294901760, %v585_v33  ;;  %p3113_p7 = por %p3112_p6, %p3111_p5 }
  0x52   :  { %v193_v31 = vsub.f32 %v3255_v18, %v192_v25  ;;  %v167_v34 = vand.u32 4294901760, %v3269_v26  ;;  %v200_v35 = vsub.f32 %v3257_v19, %v199_v27  ;;  %2691 = vmatprep.subr.bf16.mxu1 %v3142_v0  ;;  %v618_v49 = vand.u32 4294901760, %v586_v37 }
  0x53   :  { %2657 = vmatpush3.bf16.msra.mxu0 %v3262_v22  ;;  %v180_v39 = vand.u32 4294901760, %v179_v29  ;;  %v187_v40 = vand.u32 4294901760, %v186_v30  ;;  %v621_v50 = vand.u32 4294901760, %v587_v38  ;;  %v3298_v53 = vpack.c.bf16 %v615_v46, %v612_v45  ;;  %p3114_p8 = pnand %p3113_p7, %p3107_p4 }
  0x54   :  { %v168_v43 = vsub.f32 %v3269_v26, %v167_v34  ;;  %2658 = vmatprep.subr.bf16.mxu0 %v3142_v0  ;;  %v194_v44 = vand.u32 4294901760, %v193_v31  ;;  %v201_v48 = vand.u32 4294901760, %v200_v35  ;;  %v3300_v54 = vsub.f32 %v584_v32, %v612_v45 }
  0x55   :  { %v2659_v47 = vpack.c.bf16 %v187_v40, %v180_v39  ;;  %v624_v55 = vand.u32 4294901760, %v588_v42  ;;  %v3302_v58 = vsub.f32 %v585_v33, %v615_v46  ;;  %v3304_v59 = vsub.f32 %v586_v37, %v618_v49  ;;  %2693 = vmatpush3.bf16.msra.mxu1 %v3298_v53 }
  0x56   :  { %v169_v52 = vand.u32 4294901760, %v168_v43  ;;  %v3306_v60 = vsub.f32 %v587_v38, %v621_v50  ;;  %v3309_v61 = vpack.c.bf16 %v621_v50, %v618_v49  ;;  %v627_v62 = vand.u32 4294901760, %v589_v51  ;;  %2694 = vmatprep.subr.bf16.mxu1 %v3142_v0 }
  0x57   :  { %v3311_v63 = vsub.f32 %v588_v42, %v624_v55  ;;  %v2662_v2 = vpack.c.bf16 %v201_v48, %v194_v44  ;;  %v630_v3 = vand.u32 4294901760, %v590_v56  ;;  %v633_v4 = vand.u32 4294901760, %v591_v57 }
  0x58   :  { %2175 = vmatmul.mubr.f32.vlgmr.msra.gmra.mrb[0].mxu0 %v169_v52  ;;  %v3317_v5 = vsub.f32 %v589_v51, %v627_v62  ;;  %v3324_v8 = vpack.c.bf16 %v627_v62, %v624_v55  ;;  %v2665_v9 = vpack.c.bf16 %v3253_v17, %v3251_v16  ;;  %v2668_v11 = vpack.c.bf16 %v3257_v19, %v3255_v18  ;;  %v593_v16 = vld [vmem:[#allocation7 + $0x58] sm:$0xff] }
  0x59   :  { %2660 = vmatpush3.bf16.msra.mxu0 %v2659_v47  ;;  %2185 = vmatprep.mubr.msk.f32.mxu0 %vm3143_vm0, %v3957_v1  ;;  %v3319_v6 = vsub.f32 %v590_v56, %v630_v3  ;;  %v3321_v7 = vsub.f32 %v591_v57, %v633_v4  ;;  %v3332_v10 = vpack.c.bf16 %v633_v4, %v630_v3  ;;  %v636_v17 = vand.u32 4294901760, %v592_v14 }
  0x5a   :  { %2661 = vmatprep.subr.bf16.mxu0 %v3142_v0  ;;  %2696 = vmatpush3.bf16.msra.mxu1 %v3309_v61  ;;  %v2677_v12 = vpack.c.bf16 %v185_v24, %v178_v23  ;;  %v2680_v13 = vpack.c.bf16 %v199_v27, %v192_v25  ;;  %v639_v18 = vand.u32 4294901760, %v593_v16  ;;  %v645_v24 = vand.u32 4294901760, %v595_v21  ;;  %v597_v25 = vld [vmem:[#allocation7 + $0x78] sm:$0xff] }
  0x5b   :  { %2697 = vmatprep.subr.bf16.mxu1 %v3142_v0  ;;  %v651_v32 = vand.u32 4294901760, %v597_v25  ;;  %v3955_v33 = vand.u32 4294901760, %v3288_v36  ;;  %v3948_v43 = vand.u32 4294901760, %v3300_v54  ;;  %v3947_v44 = vand.u32 4294901760, %v3302_v58 }
  0x5c   :  { %v3374_v19 = vpack.c.bf16 %v639_v18, %v636_v17  ;;  %v3382_v27 = vsub.f32 %v593_v16, %v639_v18  ;;  %v3387_v30 = vsub.f32 %v595_v21, %v645_v24  ;;  %v3946_v51 = vand.u32 4294901760, %v3304_v59 }
  0x5d   :  { %2663 = vmatpush3.bf16.msra.mxu0 %v2662_v2  ;;  %v3396_v38 = vsub.f32 %v597_v25, %v651_v32  ;;  %v700_v39 = vsub.f32 %v3288_v36, %v3955_v33  ;;  %v714_v46 = vsub.f32 %v3300_v54, %v3948_v43  ;;  %v721_v47 = vsub.f32 %v3302_v58, %v3947_v44  ;;  %v3557_v33 = vld [vmem:[#allocation8 + $0x48] sm:$0xff] }
  0x5e   :  { %2664 = vmatprep.subr.bf16.mxu0 %v3142_v0  ;;  %2699 = vmatpush3.bf16.msra.mxu1 %v3324_v8  ;;  %v3945_v52 = vand.u32 4294901760, %v3306_v60  ;;  %v728_v56 = vsub.f32 %v3304_v59, %v3946_v51  ;;  %v3944_v3 = vand.u32 4294901760, %v3311_v63  ;;  %v3943_v4 = vand.u32 4294901760, %v3317_v5 }
  0x5f   :  { %2700 = vmatprep.subr.bf16.mxu1 %v3142_v0  ;;  %v701_v42 = vand.u32 4294901760, %v700_v39  ;;  %v715_v49 = vand.u32 4294901760, %v714_v46  ;;  %v722_v50 = vand.u32 4294901760, %v721_v47  ;;  %v3942_v16 = vand.u32 4294901760, %v3319_v6 }
  0x60   :  { %2186 = vmatmul.mubr.f32.vlgmr.msra.gmra.mrb[0].mxu0 %v3259_v20  ;;  %v735_v57 = vsub.f32 %v3306_v60, %v3945_v52  ;;  %v729_v62 = vand.u32 4294901760, %v728_v56  ;;  %v3939_v25 = vand.u32 4294901760, %v3382_v27  ;;  %v3937_v46 = vand.u32 4294901760, %v3387_v30 }
  0x61   :  { %2666 = vmatpush3.bf16.msra.mxu0 %v2665_v9  ;;  %2196 = vmatprep.mubr.msk.f32.mxu0 %vm3143_vm0, %v3957_v1  ;;  %v2716_v55 = vpack.c.bf16 %v722_v50, %v715_v49 }
  0x62   :  { %2667 = vmatprep.subr.bf16.mxu0 %v3142_v0  ;;  %2702 = vmatpush3.bf16.msra.mxu1 %v3332_v10  ;;  %v736_v2 = vand.u32 4294901760, %v735_v57  ;;  %v777_v39 = vsub.f32 %v3382_v27, %v3939_v25  ;;  %v791_v50 = vsub.f32 %v3387_v30, %v3937_v46 }
  0x63   :  { %2703 = vmatprep.subr.bf16.mxu1 %v3142_v0 }
  0x64   :  { %v2719_v9 = vpack.c.bf16 %v736_v2, %v729_v62  ;;  %v792_v57 = vand.u32 4294901760, %v791_v50  ;;  %v3935_v2 = vand.u32 4294901760, %v3396_v38 }
  0x65   :  { %2669 = vmatpush3.bf16.msra.mxu0 %v2668_v11  ;;  %v742_v11 = vsub.f32 %v3311_v63, %v3944_v3 }
  0x66   :  { %2670 = vmatprep.subr.bf16.mxu0 %v3142_v0  ;;  %2705 = vmatpush3.bf16.msra.mxu1 %v3374_v19 }
  0x67   :  { %2706 = vmatprep.subr.bf16.mxu1 %v3142_v0 }
  0x68   :  { %2197 = vmatmul.mubr.f32.vlgmr.msra.gmra.mrb[0].mxu0 %v3269_v26  ;;  %v3380_v26 = vsub.f32 %v592_v14, %v636_v17  ;;  %v3941_v17 = vand.u32 4294901760, %v3321_v7 }
  0x69   :  { %2672 = vmatpush3.bf16.msra.mxu0 %v3249_v15  ;;  %2207 = vmatprep.mubr.msk.f32.mxu0 %vm3143_vm0, %v3957_v1 }
  0x6a   :  { %2673 = vmatprep.subr.bf16.mxu0 %v3142_v0  ;;  %v763_v21 = vsub.f32 %v3321_v7, %v3941_v17 }
  0x6d   :  { %2675 = vmatpush3.bf16.msra.mxu0 %v3262_v22 }
  0x6e   :  { %2676 = vmatprep.subr.bf16.mxu0 %v3142_v0 }
  0x70   :  { %2208 = vmatmul.mubr.f32.vlgmr.msra.gmra.mrb[0].mxu0 %v167_v34  ;;  %v3953_v34 = vand.u32 4294901760, %v3291_v41 }
  0x71   :  { %2678 = vmatpush3.bf16.msra.mxu0 %v2677_v12  ;;  %2218 = vmatprep.mubr.msk.f32.mxu0 %vm3143_vm0, %v3957_v1  ;;  %v749_v12 = vsub.f32 %v3317_v5, %v3943_v4 }
  0x72   :  { %2679 = vmatprep.subr.bf16.mxu0 %v3142_v0  ;;  %v707_v40 = vsub.f32 %v3291_v41, %v3953_v34 }
  0x73   :  { %v750_v14 = vand.u32 4294901760, %v749_v12 }
  0x74   :  { %v708_v45 = vand.u32 4294901760, %v707_v40 }
  0x75   :  { %2681 = vmatpush3.bf16.msra.mxu0 %v2680_v13  ;;  %v743_v13 = vand.u32 4294901760, %v742_v11 }
  0x76   :  { %2682 = vmatprep.subr.bf16.mxu0 %v3142_v0  ;;  %v3414_v48 = vpack.c.bf16 %v708_v45, %v701_v42  ;;  %v778_v42 = vand.u32 4294901760, %v777_v39  ;;  %v2746_v39 = vpack.c.bf16 %v3317_v5, %v3311_v63 }
  0x77   :  { %v2722_v18 = vpack.c.bf16 %v750_v14, %v743_v13  ;;  %v805_v13 = vsub.f32 %v3396_v38, %v3935_v2 }
  0x78   :  { %2219 = vmatmul.mubr.f32.vlgmr.msra.gmra.mrb[0].mxu0 %v3259_v20 }
  0x79   :  { %2684 = vmatpush3.bf16.msra.mxu0 %v3249_v15  ;;  %2229 = vmatprep.mubr.msk.f32.mxu0 %vm3143_vm0, %v3957_v1  ;;  %v594_v15 = vld [vmem:[#allocation7 + $0x60] sm:$0xff] }
  0x7a   :  { %2685 = vmatprep.subr.bf16.mxu0 %v3142_v0  ;;  %v642_v23 = vand.u32 4294901760, %v594_v15 }
  0x7c   :  { %v3385_v29 = vsub.f32 %v594_v15, %v642_v23  ;;  %v756_v15 = vsub.f32 %v3319_v6, %v3942_v16 }
  0x7d   :  { %2687 = vmatpush3.bf16.msra.mxu0 %v3262_v22  ;;  %v3378_v22 = vpack.c.bf16 %v645_v24, %v642_v23  ;;  %v764_v24 = vand.u32 4294901760, %v763_v21 }
  0x7e   :  { %2856 = vmatprep.subr.bf16.mxu0 %v3142_v0  ;;  %v757_v23 = vand.u32 4294901760, %v756_v15  ;;  %v3938_v45 = vand.u32 4294901760, %v3385_v29  ;;  %v806_v15 = vand.u32 4294901760, %v805_v13 }
  0x7f   :  { %2708 = vmatpush3.bf16.msra.mxu1 %v3378_v22 }
  0x80   :  { %2230 = vmatmul.mubr.f32.vlgmr.msra.gmra.mrb[0].mxu0 %v3259_v20  ;;  %v596_v20 = vld [vmem:[#allocation7 + $0x70] sm:$0xff]  ;;  %2709 = vmatprep.subr.bf16.mxu1 %v3142_v0  ;;  %v784_v49 = vsub.f32 %v3385_v29, %v3938_v45 }
  0x81   :  { %2509 = vmatprep.mubr.msk.f32.mxu0 %vm3143_vm0, %v3957_v1  ;;  %v648_v31 = vand.u32 4294901760, %v596_v20 }
  0x82   :  { %v785_v56 = vand.u32 4294901760, %v784_v49 }
  0x83   :  { %v3392_v35 = vpack.c.bf16 %v651_v32, %v648_v31  ;;  %v3394_v37 = vsub.f32 %v596_v20, %v648_v31  ;;  %v3940_v20 = vand.u32 4294901760, %v3380_v26  ;;  %v2725_v31 = vpack.c.bf16 %v764_v24, %v757_v23 }
  0x84   :  { %v2731_v11 = vpack.c.bf16 %v792_v57, %v785_v56  ;;  %v2737_v23 = vpack.c.bf16 %v3291_v41, %v3288_v36  ;;  %v2740_v24 = vpack.c.bf16 %v3302_v58, %v3300_v54  ;;  %v1929_v56 = vld [vmem:[%s3929_s2] ss:$0 sm:$0xff] }
  0x85   :  { %2711 = vmatpush3.bf16.msra.mxu1 %v3392_v35  ;;  %v770_v32 = vsub.f32 %v3380_v26, %v3940_v20  ;;  %v3936_v62 = vand.u32 4294901760, %v3394_v37 }
  0x86   :  { %2712 = vmatprep.subr.bf16.mxu1 %v3142_v0 }
  0x87   :  { %v771_v40 = vand.u32 4294901760, %v770_v32  ;;  %v798_v12 = vsub.f32 %v3394_v37, %v3936_v62  ;;  %v2743_v32 = vpack.c.bf16 %v3306_v60, %v3304_v59 }
  0x89   :  { %v2728_v47 = vpack.c.bf16 %v778_v42, %v771_v40  ;;  %v799_v14 = vand.u32 4294901760, %v798_v12  ;;  %v3565_v40 = vld [vmem:[#allocation8 + $0x58] sm:$0xff] }
  0x8b   :  { %v2734_v21 = vpack.c.bf16 %v806_v15, %v799_v14 }
 0x153   :  { %v577_v57 = vpop.f32.mrb[0].mxu0 }
 0x154   :  { %v2976_v12 = vadd.f32 %v1929_v56, %v577_v57  ;;  %v2231_v13 = vpop.f32.mrb[1].mxu0 }
 0x155   :  { %v1254_v13 = vld [vmem:[#allocation8 + $0x38] sm:$0xff] }
 0x156   :  { %v581_v14 = vmax.f32 %v2976_v12, 0.0  ;;  %v1253_v12 = vld [vmem:[#allocation8 + $0x30] sm:$0xff] }
 0x157   :  { %v1289_v3 = vand.u32 4294901760, %v1253_v12 }
 0x158   :  { %v3483_v15 = vand.u32 4294901760, %v581_v14 }
 0x15a   :  { %v3486_v2 = vsub.f32 %v581_v14, %v3483_v15 }
 0x15c   :  { %v3951_v62 = vand.u32 4294901760, %v3486_v2 }
 0x15e   :  { %v689_v46 = vsub.f32 %v3486_v2, %v3951_v62  ;;  %v3551_v62 = vld [vmem:[#allocation8 + $0x40] sm:$0xff] }
 0x15f   :  { %v3965_v42 = vand.u32 4294901760, %v3551_v62 }
 0x160   :  { %v690_v45 = vand.u32 4294901760, %v689_v46 }
 0x162   :  { %2265 = vmatmul.mubr.f32.vlgmr.msra.gmra.mrb[0].mxu1 %v690_v45  ;;  %v1250_v45 = vld [vmem:[#allocation8 + $0x18] sm:$0xff] }
 0x163   :  { %2714 = vmatpush3.bf16.msra.mxu1 %v3414_v48  ;;  %2299 = vmatprep.mubr.msk.f32.mxu1 %vm3143_vm0, %v3957_v1  ;;  %v1247_v48 = vld [vmem:[#allocation8] sm:$0xff] }
 0x164   :  { %2715 = vmatprep.subr.bf16.mxu1 %v3142_v0 }
 0x167   :  { %2717 = vmatpush3.bf16.msra.mxu1 %v2716_v55  ;;  %v1248_v55 = vld [vmem:[#allocation8 + $0x8] sm:$0xff] }
 0x168   :  { %2718 = vmatprep.subr.bf16.mxu1 %v3142_v0 }
 0x16b   :  { %2720 = vmatpush3.bf16.msra.mxu1 %v2719_v9  ;;  %v1249_v9 = vld [vmem:[#allocation8 + $0x10] sm:$0xff] }
 0x16c   :  { %2721 = vmatprep.subr.bf16.mxu1 %v3142_v0  ;;  %v1277_v46 = vand.u32 4294901760, %v1249_v9 }
 0x16f   :  { %2723 = vmatpush3.bf16.msra.mxu1 %v2722_v18  ;;  %v1271_v18 = vand.u32 4294901760, %v1247_v48 }
 0x170   :  { %2724 = vmatprep.subr.bf16.mxu1 %v3142_v0 }
 0x171   :  { %v3507_v14 = vsub.f32 %v1247_v48, %v1271_v18 }
 0x173   :  { %2726 = vmatpush3.bf16.msra.mxu1 %v2725_v31  ;;  %v1274_v31 = vand.u32 4294901760, %v1248_v55  ;;  %v3949_v52 = vand.u32 4294901760, %v3507_v14 }
 0x174   :  { %2727 = vmatprep.subr.bf16.mxu1 %v3142_v0 }
 0x175   :  { %v3509_v25 = vsub.f32 %v1248_v55, %v1274_v31  ;;  %v3513_v20 = vpack.c.bf16 %v1274_v31, %v1271_v18  ;;  %v1292_v55 = vand.u32 4294901760, %v1254_v13 }
 0x177   :  { %2729 = vmatpush3.bf16.msra.mxu1 %v2728_v47  ;;  %v1251_v47 = vld [vmem:[#allocation8 + $0x20] sm:$0xff]  ;;  %v3950_v51 = vand.u32 4294901760, %v3509_v25  ;;  %v3539_v44 = vsub.f32 %v1254_v13, %v1292_v55 }
 0x178   :  { %2730 = vmatprep.subr.bf16.mxu1 %v3142_v0  ;;  %v1283_v56 = vand.u32 4294901760, %v1251_v47 }
 0x17a   :  { %v3517_v16 = vsub.f32 %v1251_v47, %v1283_v56  ;;  %v1372_v47 = vsub.f32 %v3509_v25, %v3950_v51 }
 0x17b   :  { %2732 = vmatpush3.bf16.msra.mxu1 %v2731_v11  ;;  %v1252_v11 = vld [vmem:[#allocation8 + $0x28] sm:$0xff] }
 0x17c   :  { %2733 = vmatprep.subr.bf16.mxu1 %v3142_v0  ;;  %v1286_v57 = vand.u32 4294901760, %v1252_v11  ;;  %v3956_v18 = vand.u32 4294901760, %v3517_v16 }
 0x17e   :  { %v3519_v4 = vsub.f32 %v1252_v11, %v1286_v57 }
 0x17f   :  { %2735 = vmatpush3.bf16.msra.mxu1 %v2734_v21  ;;  %v1280_v21 = vand.u32 4294901760, %v1250_v45 }
 0x180   :  { %2736 = vmatprep.subr.bf16.mxu1 %v3142_v0  ;;  %v3959_v31 = vand.u32 4294901760, %v3519_v4 }
 0x181   :  { %v3515_v17 = vsub.f32 %v1250_v45, %v1280_v21  ;;  %v3528_v45 = vsub.f32 %v1253_v12, %v1289_v3  ;;  %v1393_v12 = vsub.f32 %v3517_v16, %v3956_v18  ;;  %v3562_v49 = vpack.c.bf16 %v1280_v21, %v1277_v46 }
 0x182   :  { %2300 = vmatmul.mubr.f32.vlgmr.msra.gmra.mrb[0].mxu1 %v3483_v15  ;;  %v3582_v21 = vpack.c.bf16 %v1286_v57, %v1283_v56 }
 0x183   :  { %2738 = vmatpush3.bf16.msra.mxu1 %v2737_v23  ;;  %2334 = vmatprep.mubr.msk.f32.mxu1 %vm3143_vm0, %v3957_v1  ;;  %v3511_v23 = vsub.f32 %v1249_v9, %v1277_v46  ;;  %v3954_v9 = vand.u32 4294901760, %v3515_v17  ;;  %v3961_v51 = vand.u32 4294901760, %v3528_v45  ;;  %v3560_v1 = vld [vmem:[#allocation8 + $0x50] sm:$0xff]  ;;  %v1394_v50 = vand.u32 4294901760, %v1393_v12 }
 0x184   :  { %2739 = vmatprep.subr.bf16.mxu1 %v3142_v0 }
 0x185   :  { %v3952_v48 = vand.u32 4294901760, %v3511_v23  ;;  %v1386_v43 = vsub.f32 %v3515_v17, %v3954_v9  ;;  %v3960_v9 = vand.u32 4294901760, %v3539_v44 }
 0x187   :  { %2741 = vmatpush3.bf16.msra.mxu1 %v2740_v24  ;;  %v1365_v24 = vsub.f32 %v3507_v14, %v3949_v52  ;;  %v1379_v11 = vsub.f32 %v3511_v23, %v3952_v48  ;;  %v1400_v52 = vsub.f32 %v3519_v4, %v3959_v31  ;;  %v1373_v48 = vand.u32 4294901760, %v1372_v47 }
 0x188   :  { %2742 = vmatprep.subr.bf16.mxu1 %v3142_v0  ;;  %v1387_v18 = vand.u32 4294901760, %v1386_v43  ;;  %v1414_v47 = vsub.f32 %v3539_v44, %v3960_v9  ;;  %v3962_v43 = vand.u32 4294901760, %v3557_v33 }
 0x189   :  { %v1366_v13 = vand.u32 4294901760, %v1365_v24  ;;  %v1380_v34 = vand.u32 4294901760, %v1379_v11  ;;  %v1407_v24 = vsub.f32 %v3528_v45, %v3961_v51  ;;  %v3975_v51 = vpack.c.bf16 %v3321_v7, %v3319_v6 }
 0x18a   :  { %v3590_v11 = vsub.f32 %v3557_v33, %v3962_v43 }
 0x18b   :  { %2744 = vmatpush3.bf16.msra.mxu1 %v2743_v32  ;;  %v2857_v31 = vpack.c.bf16 %v1373_v48, %v1366_v13  ;;  %v1401_v32 = vand.u32 4294901760, %v1400_v52  ;;  %v2860_v46 = vpack.c.bf16 %v1387_v18, %v1380_v34  ;;  %v3580_v52 = vsub.f32 %v3551_v62, %v3965_v42  ;;  %v3595_v18 = vld [vmem:[#allocation8 + $0x60] sm:$0xff] }
 0x18c   :  { %2745 = vmatprep.subr.bf16.mxu1 %v3142_v0  ;;  %v3963_v48 = vand.u32 4294901760, %v3560_v1  ;;  %3974 = vst [vmem:[#allocation15_spill] sm:$0xff] %v3590_v11  ;;  %v3964_v34 = vand.u32 4294901760, %v3565_v40  ;;  %v3968_v12 = vand.u32 4294901760, %v3595_v18  ;;  %v3967_v9 = vand.u32 4294901760, %v3590_v11 }
 0x18d   :  { %2858 = vmatpush3.bf16.msra.mxu0 %v2857_v31  ;;  %v3597_v31 = vld [vmem:[#allocation8 + $0x68] sm:$0xff]  ;;  %v3966_v56 = vand.u32 4294901760, %v3580_v52  ;;  %v2863_v13 = vpack.c.bf16 %v1401_v32, %v1394_v50  ;;  %v1408_v43 = vand.u32 4294901760, %v1407_v24 }
 0x18e   :  { %2859 = vmatprep.subr.bf16.mxu0 %v3142_v0  ;;  %v3603_v57 = vsub.f32 %v3560_v1, %v3963_v48  ;;  %v1415_v48 = vand.u32 4294901760, %v1414_v47  ;;  %v3976_v47 = vpack.c.bf16 %v3382_v27, %v3380_v26 }
 0x18f   :  { %2747 = vmatpush3.bf16.msra.mxu1 %v2746_v39  ;;  %v3593_v39 = vpack.c.bf16 %v1292_v55, %v1289_v3  ;;  %v3610_v3 = vsub.f32 %v3565_v40, %v3964_v34  ;;  %v3969_v55 = vand.u32 4294901760, %v3597_v31  ;;  %v1421_v50 = vsub.f32 %v3580_v52, %v3966_v56 }
 0x190   :  { %2748 = vmatprep.subr.bf16.mxu1 %v3142_v0  ;;  %v3973_v32 = vand.u32 4294901760, %v3603_v57  ;;  %v1428_v34 = vsub.f32 %v3590_v11, %v3967_v9 }
 0x191   :  { %2861 = vmatpush3.bf16.msra.mxu0 %v2860_v46  ;;  %v3972_v42 = vand.u32 4294901760, %v3610_v3  ;;  %v3634_v24 = vsub.f32 %v3597_v31, %v3969_v55  ;;  %v2866_v46 = vpack.c.bf16 %v1415_v48, %v1408_v43  ;;  %v1422_v56 = vand.u32 4294901760, %v1421_v50 }
 0x192   :  { %2862 = vmatprep.subr.bf16.mxu0 %v3142_v0  ;;  %v1429_v9 = vand.u32 4294901760, %v1428_v34  ;;  %v3977_v43 = vpack.c.bf16 %v3387_v30, %v3385_v29 }
 0x193   :  { %2750 = vmatpush3.bf16.msra.mxu1 %v3975_v51  ;;  %v3629_v51 = vsub.f32 %v3595_v18, %v3968_v12  ;;  %v1435_v12 = vsub.f32 %v3603_v57, %v3973_v32  ;;  %v1442_v55 = vsub.f32 %v3610_v3, %v3972_v42  ;;  %v3978_v32 = vpack.c.bf16 %v3396_v38, %v3394_v37 }
 0x194   :  { %2751 = vmatprep.subr.bf16.mxu1 %v3142_v0  ;;  %v2869_v48 = vpack.c.bf16 %v1429_v9, %v1422_v56 }
 0x195   :  { %2864 = vmatpush3.bf16.msra.mxu0 %v2863_v13  ;;  %v1448_v11 = vand.u32 4294901760, %v3629_v51  ;;  %v1436_v34 = vand.u32 4294901760, %v1435_v12  ;;  %v1443_v13 = vand.u32 4294901760, %v1442_v55  ;;  %v3979_v55 = vmov 0.0  }
 0x196   :  { %2865 = vmatprep.subr.bf16.mxu0 %v3142_v0 }
 0x197   :  { %2753 = vmatpush3.bf16.msra.mxu1 %v3976_v47  ;;  %v1455_v47 = vand.u32 4294901760, %v3634_v24  ;;  %v1449_v50 = vsub.f32 %v3629_v51, %v1448_v11  ;;  %v2872_v9 = vpack.c.bf16 %v1443_v13, %v1436_v34  ;;  %v3983_v34 = vand.u32 4294901760, %v3300_v54 }
 0x198   :  { %2754 = vmatprep.subr.bf16.mxu1 %v3142_v0  ;;  %v3984_v13 = vand.u32 4294901760, %v3302_v58  ;;  %v3988_v54 = vand.u32 4294901760, %v3317_v5  ;;  %v3994_v5 = vand.u32 4294901760, %v3387_v30  ;;  %v3997_v30 = vand.u32 4294901760, %v3551_v62 }
 0x199   :  { %2867 = vmatpush3.bf16.msra.mxu0 %v2866_v46  ;;  %v1456_v42 = vsub.f32 %v3634_v24, %v1455_v47  ;;  %v1450_v56 = vand.u32 4294901760, %v1449_v50  ;;  %v4002_v62 = vand.u32 4294901760, %v3597_v31 }
 0x19a   :  { %2868 = vmatprep.subr.bf16.mxu0 %v3142_v0  ;;  %v2788_v50 = vpack.c.bf16 %v3984_v13, %v3983_v34  ;;  %v3999_v34 = vand.u32 4294901760, %v3560_v1  ;;  %v4000_v13 = vand.u32 4294901760, %v3565_v40 }
 0x19b   :  { %2756 = vmatpush3.bf16.msra.mxu1 %v3977_v43  ;;  %v1457_v12 = vand.u32 4294901760, %v1456_v42  ;;  %v3980_v42 = vand.u32 4294901760, %v3288_v36  ;;  %v3985_v36 = vand.u32 4294901760, %v3304_v59  ;;  %v3991_v59 = vand.u32 4294901760, %v3380_v26 }
 0x19c   :  { %2757 = vmatprep.subr.bf16.mxu1 %v3142_v0 }
 0x19d   :  { %2870 = vmatpush3.bf16.msra.mxu0 %v2869_v48  ;;  %v2875_v46 = vpack.c.bf16 %v1457_v12, %v1450_v56  ;;  %v3982_v48 = vand.u32 4294901760, %v3486_v2  ;;  %v3989_v56 = vand.u32 4294901760, %v3319_v6  ;;  %v3990_v12 = vand.u32 4294901760, %v3321_v7 }
 0x19e   :  { %2871 = vmatprep.subr.bf16.mxu0 %v3142_v0  ;;  %v3995_v6 = vand.u32 4294901760, %v3394_v37  ;;  %v3996_v7 = vand.u32 4294901760, %v3396_v38 }
 0x19f   :  { %2759 = vmatpush3.bf16.msra.mxu1 %v3978_v32  ;;  %v3981_v32 = vand.u32 4294901760, %v3291_v41  ;;  %v3986_v41 = vand.u32 4294901760, %v3306_v60  ;;  %v3992_v60 = vand.u32 4294901760, %v3382_v27 }
 0x1a0   :  { %2760 = vmatprep.subr.bf16.mxu1 %v3142_v0 }
 0x1a1   :  { %2873 = vmatpush3.bf16.msra.mxu0 %v2872_v9  ;;  %v2785_v43 = vpack.c.bf16 %v3981_v32, %v3980_v42  ;;  %v2791_v9 = vpack.c.bf16 %v3986_v41, %v3985_v36  ;;  %v2800_v42 = vpack.c.bf16 %v3992_v60, %v3991_v59  ;;  %v1930_v41 = vld [vmem:[%s3931_s4] ss:$0 sm:$0xff]  ;;  %v2887_v60 = vpack.c.bf16 %v3519_v4, %v3517_v16 }
 0x1a2   :  { %2335 = vmatmul.mubr.f32.vlgmr.msra.gmra.mrb[0].mxu1 %v3486_v2  ;;  %2874 = vmatprep.subr.bf16.mxu0 %v3142_v0  ;;  %v3987_v2 = vand.u32 4294901760, %v3311_v63  ;;  %v3993_v63 = vand.u32 4294901760, %v3385_v29 }
 0x1a3   :  { %2762 = vmatpush3.bf16.msra.mxu1 %v3272_v28  ;;  %2369 = vmatprep.mubr.msk.f32.mxu1 %vm3143_vm0, %v3979_v55 }
 0x1a4   :  { %2763 = vmatprep.subr.bf16.mxu1 %v3142_v0  ;;  %v2794_v58 = vpack.c.bf16 %v3988_v54, %v3987_v2  ;;  %v2803_v32 = vpack.c.bf16 %v3994_v5, %v3993_v63  ;;  %v2881_v54 = vpack.c.bf16 %v3509_v25, %v3507_v14  ;;  %v2890_v63 = vpack.c.bf16 %v3539_v44, %v3528_v45  ;;  %v4003_v5 = vld [vmem:[#allocation15_spill] sm:$0xff] }
 0x1a5   :  { %2876 = vmatpush3.bf16.msra.mxu0 %v2875_v46  ;;  %v2797_v46 = vpack.c.bf16 %v3990_v12, %v3989_v56  ;;  %v2884_v12 = vpack.c.bf16 %v3515_v17, %v3511_v23 }
 0x1a6   :  { %2877 = vmatprep.subr.bf16.mxu0 %v3142_v0 }
 0x1a7   :  { %2765 = vmatpush3.bf16.msra.mxu1 %v3298_v53 }
 0x1a8   :  { %2766 = vmatprep.subr.bf16.mxu1 %v3142_v0 }
 0x1ab   :  { %2768 = vmatpush3.bf16.msra.mxu1 %v3309_v61 }
 0x1ac   :  { %2769 = vmatprep.subr.bf16.mxu1 %v3142_v0 }
 0x1af   :  { %2771 = vmatpush3.bf16.msra.mxu1 %v3324_v8 }
 0x1b0   :  { %2772 = vmatprep.subr.bf16.mxu1 %v3142_v0 }
 0x1b3   :  { %2774 = vmatpush3.bf16.msra.mxu1 %v3332_v10 }
 0x1b4   :  { %2775 = vmatprep.subr.bf16.mxu1 %v3142_v0 }
 0x1b7   :  { %2777 = vmatpush3.bf16.msra.mxu1 %v3374_v19 }
 0x1b8   :  { %2778 = vmatprep.subr.bf16.mxu1 %v3142_v0 }
 0x1bb   :  { %2780 = vmatpush3.bf16.msra.mxu1 %v3378_v22 }
 0x1bc   :  { %2781 = vmatprep.subr.bf16.mxu1 %v3142_v0 }
 0x1bf   :  { %2783 = vmatpush3.bf16.msra.mxu1 %v3392_v35 }
 0x1c0   :  { %2784 = vmatprep.subr.bf16.mxu1 %v3142_v0 }
 0x1c2   :  { %2370 = vmatmul.mubr.f32.vlgmr.msra.gmra.mrb[0].mxu1 %v3982_v48 }
 0x1c3   :  { %2786 = vmatpush3.bf16.msra.mxu1 %v2785_v43  ;;  %2404 = vmatprep.mubr.msk.f32.mxu1 %vm3143_vm0, %v3979_v55  ;;  %v2806_v43 = vpack.c.bf16 %v3996_v7, %v3995_v6  ;;  %v2896_v6 = vpack.c.bf16 %v3610_v3, %v3603_v57  ;;  %v2899_v7 = vpack.c.bf16 %v3634_v24, %v3629_v51 }
 0x1c4   :  { %2787 = vmatprep.subr.bf16.mxu1 %v3142_v0 }
 0x1c7   :  { %2789 = vmatpush3.bf16.msra.mxu1 %v2788_v50  ;;  %v3784_v50 = vpack.c.bf16 %v4000_v13, %v3999_v34 }
 0x1c8   :  { %2790 = vmatprep.subr.bf16.mxu1 %v3142_v0 }
 0x1cb   :  { %2792 = vmatpush3.bf16.msra.mxu1 %v2791_v9 }
 0x1cc   :  { %2793 = vmatprep.subr.bf16.mxu1 %v3142_v0 }
 0x1cf   :  { %2795 = vmatpush3.bf16.msra.mxu1 %v2794_v58 }
 0x1d0   :  { %2796 = vmatprep.subr.bf16.mxu1 %v3142_v0 }
 0x1d3   :  { %2798 = vmatpush3.bf16.msra.mxu1 %v2797_v46 }
 0x1d4   :  { %2799 = vmatprep.subr.bf16.mxu1 %v3142_v0 }
 0x1d7   :  { %2801 = vmatpush3.bf16.msra.mxu1 %v2800_v42 }
 0x1d8   :  { %2802 = vmatprep.subr.bf16.mxu1 %v3142_v0 }
 0x1db   :  { %2804 = vmatpush3.bf16.msra.mxu1 %v2803_v32  ;;  %v2893_v32 = vpack.c.bf16 %v4003_v5, %v3580_v52 }
 0x1dc   :  { %2805 = vmatprep.subr.bf16.mxu1 %v3142_v0 }
 0x1df   :  { %2807 = vmatpush3.bf16.msra.mxu1 %v2806_v43  ;;  %v4004_v43 = vand.u32 4294901760, %v3507_v14  ;;  %v4008_v14 = vand.u32 4294901760, %v3517_v16  ;;  %v4015_v16 = vand.u32 4294901760, %v3610_v3 }
 0x1e0   :  { %2808 = vmatprep.subr.bf16.mxu1 %v3142_v0 }
 0x1e2   :  { %2405 = vmatmul.mubr.f32.vlgmr.msra.gmra.mrb[0].mxu1 %v3483_v15 }
 0x1e3   :  { %2810 = vmatpush3.bf16.msra.mxu1 %v3272_v28  ;;  %2439 = vmatprep.mubr.msk.f32.mxu1 %vm3143_vm0, %v3979_v55  ;;  %v1261_v28 = vld [vmem:[#allocation8 + $0x70] sm:$0xff] }
 0x1e4   :  { %2811 = vmatprep.subr.bf16.mxu1 %v3142_v0 }
 0x1e7   :  { %2813 = vmatpush3.bf16.msra.mxu1 %v3298_v53  ;;  %v1262_v53 = vld [vmem:[#allocation8 + $0x78] sm:$0xff] }
 0x1e8   :  { %2814 = vmatprep.subr.bf16.mxu1 %v3142_v0 }
 0x1eb   :  { %2816 = vmatpush3.bf16.msra.mxu1 %v3309_v61  ;;  %v1313_v61 = vand.u32 4294901760, %v1261_v28 }
 0x1ec   :  { %2817 = vmatprep.subr.bf16.mxu1 %v3142_v0 }
 0x1ef   :  { %2819 = vmatpush3.bf16.msra.mxu1 %v3324_v8  ;;  %v1316_v8 = vand.u32 4294901760, %v1262_v53 }
 0x1f0   :  { %2820 = vmatprep.subr.bf16.mxu1 %v3142_v0 }
 0x1f1   :  { %v3797_v1 = vpack.c.bf16 %v1316_v8, %v1313_v61 }
 0x1f3   :  { %2822 = vmatpush3.bf16.msra.mxu1 %v3332_v10  ;;  %v3760_v10 = vsub.f32 %v1261_v28, %v1313_v61  ;;  %v4005_v28 = vand.u32 4294901760, %v3509_v25  ;;  %v4006_v61 = vand.u32 4294901760, %v3511_v23  ;;  %v4009_v25 = vand.u32 4294901760, %v3519_v4 }
 0x1f4   :  { %2823 = vmatprep.subr.bf16.mxu1 %v3142_v0  ;;  %v4011_v23 = vand.u32 4294901760, %v3539_v44  ;;  %v4014_v4 = vand.u32 4294901760, %v3603_v57  ;;  %v2947_v44 = vpack.c.bf16 %v1455_v47, %v1448_v11 }
 0x1f7   :  { %2825 = vmatpush3.bf16.msra.mxu1 %v3374_v19  ;;  %v3762_v19 = vsub.f32 %v1262_v53, %v1316_v8  ;;  %v2929_v53 = vpack.c.bf16 %v4005_v28, %v4004_v43  ;;  %v4007_v8 = vand.u32 4294901760, %v3515_v17 }
 0x1f8   :  { %2826 = vmatprep.subr.bf16.mxu1 %v3142_v0 }
 0x1f9   :  { %v1469_v26 = vand.u32 4294901760, %v3762_v19  ;;  %v2902_v40 = vpack.c.bf16 %v3762_v19, %v3760_v10 }
 0x1fb   :  { %2828 = vmatpush3.bf16.msra.mxu1 %v3378_v22  ;;  %v1462_v22 = vand.u32 4294901760, %v3760_v10  ;;  %v1470_v29 = vsub.f32 %v3762_v19, %v1469_v26 }
 0x1fc   :  { %2829 = vmatprep.subr.bf16.mxu1 %v3142_v0 }
 0x1fd   :  { %v1463_v27 = vsub.f32 %v3760_v10, %v1462_v22 }
 0x1ff   :  { %2831 = vmatpush3.bf16.msra.mxu1 %v3392_v35  ;;  %v3998_v35 = vand.u32 4294901760, %v3557_v33  ;;  %v1464_v38 = vand.u32 4294901760, %v1463_v27  ;;  %v4001_v33 = vand.u32 4294901760, %v3595_v18  ;;  %v2932_v27 = vpack.c.bf16 %v4007_v8, %v4006_v61 }
 0x200   :  { %2832 = vmatprep.subr.bf16.mxu1 %v3142_v0 }
 0x201   :  { %v3776_v37 = vpack.c.bf16 %v3998_v35, %v3997_v30  ;;  %v3793_v36 = vpack.c.bf16 %v4002_v62, %v4001_v33  ;;  %v4010_v30 = vand.u32 4294901760, %v3528_v45  ;;  %v4012_v35 = vand.u32 4294901760, %v3580_v52  ;;  %v1931_v52 = vld [vmem:[%s3933_s6] ss:$0 sm:$0xff] }
 0x202   :  { %2440 = vmatmul.mubr.f32.vlgmr.msra.gmra.mrb[0].mxu1 %v3483_v15  ;;  %v1471_v15 = vand.u32 4294901760, %v1470_v29  ;;  %v2935_v29 = vpack.c.bf16 %v4009_v25, %v4008_v14  ;;  %v2950_v45 = vpack.c.bf16 %v1469_v26, %v1462_v22 }
 0x203   :  { %2834 = vmatpush3.bf16.msra.mxu1 %v3513_v20  ;;  %2474 = vmatprep.mubr.msk.f32.mxu1 %vm3143_vm0, %v3979_v55  ;;  %v2938_v17 = vpack.c.bf16 %v4011_v23, %v4010_v30 }
 0x204   :  { %2835 = vmatprep.subr.bf16.mxu1 %v3142_v0  ;;  %v2878_v48 = vpack.c.bf16 %v1471_v15, %v1464_v38  ;;  %v4013_v38 = vand.u32 4294901760, %v4003_v5 }
 0x206   :  { %2879 = vmatpush3.bf16.msra.mxu0 %v2878_v48  ;;  %v2941_v15 = vpack.c.bf16 %v4013_v38, %v4012_v35  ;;  %v2944_v48 = vpack.c.bf16 %v4015_v16, %v4014_v4 }
 0x207   :  { %2837 = vmatpush3.bf16.msra.mxu1 %v3562_v49  ;;  %2880 = vmatprep.subr.bf16.mxu0 %v3142_v0 }
 0x208   :  { %2838 = vmatprep.subr.bf16.mxu1 %v3142_v0 }
 0x20b   :  { %2840 = vmatpush3.bf16.msra.mxu1 %v3582_v21 }
 0x20c   :  { %2841 = vmatprep.subr.bf16.mxu1 %v3142_v0 }
 0x20f   :  { %2843 = vmatpush3.bf16.msra.mxu1 %v3593_v39 }
 0x210   :  { %2844 = vmatprep.subr.bf16.mxu1 %v3142_v0 }
 0x213   :  { %2846 = vmatpush3.bf16.msra.mxu1 %v3776_v37 }
 0x214   :  { %2847 = vmatprep.subr.bf16.mxu1 %v3142_v0 }
 0x217   :  { %2849 = vmatpush3.bf16.msra.mxu1 %v3784_v50 }
 0x218   :  { %2850 = vmatprep.subr.bf16.mxu1 %v3142_v0 }
 0x21b   :  { %2852 = vmatpush3.bf16.msra.mxu1 %v3793_v36 }
 0x21c   :  { %2853 = vmatprep.subr.bf16.mxu1 %v3142_v0 }
 0x21f   :  { %2855 = vmatpush3.bf16.msra.mxu1 %v3797_v1 }
 0x2d5   :  { %v1242_v18 = vpop.f32.mrb[0].mxu1 }
 0x2d6   :  { %v2977_v9 = vadd.f32 %v1930_v41, %v1242_v18  ;;  %v2441_v31 = vpop.f32.mrb[1].mxu1 }
 0x2d8   :  { %v1246_v2 = vmax.f32 %v2977_v9, 0.0 }
 0x2da   :  { %v3807_v58 = vand.u32 4294901760, %v1246_v2 }
 0x2dc   :  { %v1352_v56 = vsub.f32 %v1246_v2, %v3807_v58  ;;  %2510 = vmatmul.mubr.f32.vlgmr.msra.gmra.mrb[2].mxu0 %v3807_v58 }
 0x2dd   :  { %2882 = vmatpush3.bf16.msra.mxu0 %v2881_v54  ;;  %2544 = vmatprep.mubr.msk.f32.mxu0 %vm3143_vm0, %v3979_v55 }
 0x2de   :  { %v1353_v46 = vand.u32 4294901760, %v1352_v56  ;;  %2883 = vmatprep.subr.bf16.mxu0 %v3142_v0 }
 0x2e0   :  { %v1354_v59 = vsub.f32 %v1352_v56, %v1353_v46 }
 0x2e1   :  { %2885 = vmatpush3.bf16.msra.mxu0 %v2884_v12 }
 0x2e2   :  { %2886 = vmatprep.subr.bf16.mxu0 %v3142_v0  ;;  %v1355_v42 = vand.u32 4294901760, %v1354_v59 }
 0x2e4   :  { %2475 = vmatmul.mubr.f32.vlgmr.msra.gmra.mrb[2].mxu1 %v1355_v42 }
 0x2e5   :  { %2888 = vmatpush3.bf16.msra.mxu0 %v2887_v60 }
 0x2e6   :  { %2889 = vmatprep.subr.bf16.mxu0 %v3142_v0 }
 0x2e9   :  { %2891 = vmatpush3.bf16.msra.mxu0 %v2890_v63 }
 0x2ea   :  { %2892 = vmatprep.subr.bf16.mxu0 %v3142_v0 }
 0x2ed   :  { %2894 = vmatpush3.bf16.msra.mxu0 %v2893_v32 }
 0x2ee   :  { %2895 = vmatprep.subr.bf16.mxu0 %v3142_v0 }
 0x2f1   :  { %2897 = vmatpush3.bf16.msra.mxu0 %v2896_v6 }
 0x2f2   :  { %2898 = vmatprep.subr.bf16.mxu0 %v3142_v0 }
 0x2f5   :  { %2900 = vmatpush3.bf16.msra.mxu0 %v2899_v7 }
 0x2f6   :  { %2901 = vmatprep.subr.bf16.mxu0 %v3142_v0 }
 0x2f9   :  { %2903 = vmatpush3.bf16.msra.mxu0 %v2902_v40 }
 0x2fa   :  { %2904 = vmatprep.subr.bf16.mxu0 %v3142_v0 }
 0x2fc   :  { %2545 = vmatmul.mubr.f32.vlgmr.msra.gmra.mrb[2].mxu0 %v1352_v56 }
 0x2fd   :  { %2906 = vmatpush3.bf16.msra.mxu0 %v3513_v20  ;;  %2579 = vmatprep.mubr.msk.f32.mxu0 %vm3143_vm0, %v3979_v55 }
 0x2fe   :  { %2907 = vmatprep.subr.bf16.mxu0 %v3142_v0 }
 0x301   :  { %2909 = vmatpush3.bf16.msra.mxu0 %v3562_v49 }
 0x302   :  { %2910 = vmatprep.subr.bf16.mxu0 %v3142_v0 }
 0x305   :  { %2912 = vmatpush3.bf16.msra.mxu0 %v3582_v21 }
 0x306   :  { %2913 = vmatprep.subr.bf16.mxu0 %v3142_v0 }
 0x309   :  { %2915 = vmatpush3.bf16.msra.mxu0 %v3593_v39 }
 0x30a   :  { %2916 = vmatprep.subr.bf16.mxu0 %v3142_v0 }
 0x30d   :  { %2918 = vmatpush3.bf16.msra.mxu0 %v3776_v37 }
 0x30e   :  { %2919 = vmatprep.subr.bf16.mxu0 %v3142_v0 }
 0x311   :  { %2921 = vmatpush3.bf16.msra.mxu0 %v3784_v50 }
 0x312   :  { %2922 = vmatprep.subr.bf16.mxu0 %v3142_v0 }
 0x315   :  { %2924 = vmatpush3.bf16.msra.mxu0 %v3793_v36 }
 0x316   :  { %2925 = vmatprep.subr.bf16.mxu0 %v3142_v0 }
 0x319   :  { %2927 = vmatpush3.bf16.msra.mxu0 %v3797_v1 }
 0x31a   :  { %2928 = vmatprep.subr.bf16.mxu0 %v3142_v0 }
 0x31c   :  { %2580 = vmatmul.mubr.f32.vlgmr.msra.gmra.mrb[2].mxu0 %v1353_v46 }
 0x31d   :  { %2930 = vmatpush3.bf16.msra.mxu0 %v2929_v53  ;;  %2614 = vmatprep.mubr.msk.f32.mxu0 %vm3143_vm0, %v3979_v55 }
 0x31e   :  { %2931 = vmatprep.subr.bf16.mxu0 %v3142_v0 }
 0x321   :  { %2933 = vmatpush3.bf16.msra.mxu0 %v2932_v27 }
 0x322   :  { %2934 = vmatprep.subr.bf16.mxu0 %v3142_v0 }
 0x325   :  { %2936 = vmatpush3.bf16.msra.mxu0 %v2935_v29 }
 0x326   :  { %2937 = vmatprep.subr.bf16.mxu0 %v3142_v0 }
 0x329   :  { %2939 = vmatpush3.bf16.msra.mxu0 %v2938_v17 }
 0x32a   :  { %2940 = vmatprep.subr.bf16.mxu0 %v3142_v0 }
 0x32d   :  { %2942 = vmatpush3.bf16.msra.mxu0 %v2941_v15 }
 0x32e   :  { %2943 = vmatprep.subr.bf16.mxu0 %v3142_v0 }
 0x331   :  { %2945 = vmatpush3.bf16.msra.mxu0 %v2944_v48 }
 0x332   :  { %2946 = vmatprep.subr.bf16.mxu0 %v3142_v0 }
 0x335   :  { %2948 = vmatpush3.bf16.msra.mxu0 %v2947_v44 }
 0x336   :  { %2949 = vmatprep.subr.bf16.mxu0 %v3142_v0 }
 0x339   :  { %2951 = vmatpush3.bf16.msra.mxu0 %v2950_v45 }
 0x33a   :  { %2952 = vmatprep.subr.bf16.mxu0 %v3142_v0 }
 0x33c   :  { %2615 = vmatmul.mubr.f32.vlgmr.msra.gmra.mrb[2].mxu0 %v3807_v58 }
 0x33d   :  { %2954 = vmatpush3.bf16.msra.mxu0 %v3513_v20  ;;  %2649 = vmatprep.mubr.msk.f32.mxu0 %vm3143_vm0, %v3979_v55 }
 0x33e   :  { %2955 = vmatprep.subr.bf16.mxu0 %v3142_v0 }
 0x341   :  { %2957 = vmatpush3.bf16.msra.mxu0 %v3562_v49 }
 0x342   :  { %2958 = vmatprep.subr.bf16.mxu0 %v3142_v0 }
 0x345   :  { %2960 = vmatpush3.bf16.msra.mxu0 %v3582_v21 }
 0x346   :  { %2961 = vmatprep.subr.bf16.mxu0 %v3142_v0 }
 0x349   :  { %2963 = vmatpush3.bf16.msra.mxu0 %v3593_v39 }
 0x34a   :  { %2964 = vmatprep.subr.bf16.mxu0 %v3142_v0 }
 0x34d   :  { %2966 = vmatpush3.bf16.msra.mxu0 %v3776_v37 }
 0x34e   :  { %2967 = vmatprep.subr.bf16.mxu0 %v3142_v0 }
 0x351   :  { %2969 = vmatpush3.bf16.msra.mxu0 %v3784_v50 }
 0x352   :  { %2970 = vmatprep.subr.bf16.mxu0 %v3142_v0 }
 0x355   :  { %2972 = vmatpush3.bf16.msra.mxu0 %v3793_v36 }
 0x356   :  { %2973 = vmatprep.subr.bf16.mxu0 %v3142_v0 }
 0x359   :  { %2975 = vmatpush3.bf16.msra.mxu0 %v3797_v1 }
 0x35c   :  { %2650 = vmatmul.mubr.f32.vlgmr.msra.gmra.mrb[2].mxu0 %v3807_v58 }
 0x3b7   :  { %v1357_v20 = vpop.f32.mrb[2].mxu1 }
 0x3b8   :  { %v2476_v49 = vpop.f32.mrb[3].mxu1  ;;  %v1358_v21 = vadd.f32 %v1931_v52, %v1357_v20 }
 0x42f   :  { %v1907_v11 = vpop.f32.mrb[2].mxu0 }
 0x430   :  { %v2979_v39 = vadd.f32 %v1907_v11, %v1358_v21  ;;  %v2651_v57 = vpop.f32.mrb[3].mxu0 }
 0x432   :  { %1911 = vst [vmem:[#allocation10] sm:$0xff] %v2979_v39 }
 0x433   :  { %3117 = shalt.err (!%p3114_p8)
}
 0x434   :  { %s3118_s9 = scalar_lea.hbm %s3934_s7, 128 }
 0x435   :  { %p3119_p9 = scmp.ne.s32.totalorder %s3934_s7, %s3118_s9  ;;  %p3122_p10 = scmp.lt.u32.totalorder %s3118_s9, %s3934_s7 }
 0x437   :  { %p3124_p11 = pnand %p3122_p10, %p3119_p9 }
 0x439   :  { %3127 = shalt.err (!%p3124_p11)
}
 0x43a   :  { %1921 = dma.vmem_to_hbm [thread:$0]  %s1919_s28, 128, %s3934_s7, [#allocation4]  }
 0x43b   :  { %3134 = dma.done.wait [#allocation4], 128  }
 0x43c   :  { %3135 = vsyncadd [#allocation4], 4294967168 }
 0x43d   :  { %1925 = vsyncpa [#allocation3], 1 }
 0x43e   :  { %1926 = vsyncpa [#allocation6], 1 }
 0x43f   :  { %1927 = vsyncpa [#allocation9], 1 }
 0x440   :  { %1928 = vsyncpa [#allocation4], 1 }

</bundles_post_ra>
